<compile_context>
chip_gen: v7x
topology: tpu7x:2x2x1
jax: 0.10.0
libtpu: 0.0.40
codegen_flags: <defaults>
</compile_context>

<pallas_src>
import jax
import jax.numpy as jnp
from jax.experimental import pallas as pl
from jax.experimental.pallas import tpu as pltpu


def _round_up(x, m):
    return (x + m - 1) // m * m


def _itemsize(dtype):
    return 2 if dtype == jnp.bfloat16 else 4


# ----------------------------------------------------------------------------
# Kernel 1: fused projection.
#   gates    = x @ [W_ih_fwd | W_ih_bwd] + [b_fwd | b_bwd]   (one MXU pass)
#   logits_1 = x @ w1 + b1                                    (VPU/XLU, fused)
# x is the batch-major activation flattened to (Bp*Sp, 2H); no transpose and
# no lane-padded logits column are materialized.
# ----------------------------------------------------------------------------
def _proj_kernel(x_ref, wg_ref, bg_ref, w1_ref, b1_ref, g_ref, l1_ref):
    x = x_ref[...]                                            # (tm, 2H) f32
    g = jnp.dot(x.astype(wg_ref.dtype), wg_ref[...],
                preferred_element_type=jnp.float32) + bg_ref[...]
    g_ref[...] = g.astype(g_ref.dtype)
    # logits_1 head as multiply + lane reduction (shares the already-loaded x)
    l1_ref[...] = jnp.sum(x * w1_ref[...], axis=1, keepdims=True) + b1_ref[...]


def _pick_row_tile(M, D, N, gate_dtype):
    gi = _itemsize(gate_dtype)
    weights = D * N * gi + (N + D + 2) * 4
    budget = 28 * 1024 * 1024
    tm = 8
    for t in (1024, 512, 256, 128, 64, 32, 16, 8):
        if M % t == 0 and weights + 2 * t * (D * 4 + N * gi + 4) <= budget:
            tm = t
            break
    need = weights + 2 * tm * (D * 4 + N * gi + 4) + (2 << 20)
    vmem_limit = int(min(max(need, 16 * 1024 * 1024), 64 * 1024 * 1024))
    return tm, vmem_limit


def fused_projection(x, w_gates, b_gates, w1_row, b1, *, gate_dtype):
    """x: (M, 2H) f32 -> (gates (M, 8H) gate_dtype, logits_1 (M, 1) f32)."""
    M, D = x.shape
    N = w_gates.shape[1]
    tm, vmem_limit = _pick_row_tile(M, D, N, gate_dtype)
    return pl.pallas_call(
        _proj_kernel,
        out_shape=(jax.ShapeDtypeStruct((M, N), gate_dtype),
                   jax.ShapeDtypeStruct((M, 1), jnp.float32)),
        grid=(M // tm,),
        in_specs=[
            pl.BlockSpec((tm, D), lambda i: (i, 0)),
            pl.BlockSpec((D, N), lambda i: (0, 0)),
            pl.BlockSpec((1, N), lambda i: (0, 0)),
            pl.BlockSpec((1, D), lambda i: (0, 0)),
            pl.BlockSpec((1, 1), lambda i: (0, 0)),
        ],
        out_specs=(pl.BlockSpec((tm, N), lambda i: (i, 0)),
                   pl.BlockSpec((tm, 1), lambda i: (i, 0))),
        compiler_params=pltpu.CompilerParams(
            dimension_semantics=("parallel",),
            vmem_limit_bytes=vmem_limit),
    )(x, w_gates, b_gates, w1_row, b1)


# ----------------------------------------------------------------------------
# Kernel 2: time-blocked bidirectional LSTM recurrence with the logits_2 head
# fused in.  grid = (direction, time-block); direction is "parallel" (v7x
# megacore split), time-blocks are "arbitrary" (serial, state in VMEM scratch).
# pack_padded_sequence semantics are emulated by mask-gating the state update
# (right-padded masks); padded outputs contribute zero, like pad_packed.
# ----------------------------------------------------------------------------
def _bilstm_kernel(xg_ref, m_ref, whh_ref, w2_ref, l2_ref, h_sc, c_sc):
    # xg_ref : (Bp, T_blk, 4H) gate pre-activations for this (dir, time-block)
    # m_ref  : (1, Bp, T_blk)  mask for this time block
    # whh_ref: (1, H, 4H)      recurrent weights for this direction
    # w2_ref : (1, 1, H)       logits_2 head row for this direction
    # l2_ref : (1, 1, Bp, T_blk) per-direction logits_2 contributions
    # h_sc/c_sc: (2, Bp, H)    persistent per-direction LSTM state
    H = whh_ref.shape[1]
    T = xg_ref.shape[1]
    g_blk = pl.program_id(1)

    whh = whh_ref[0]                                          # (H, 4H)
    w2 = w2_ref[0]                                            # (1, H)

    def run_direction(d_idx, reverse):
        @pl.when(g_blk == 0)
        def _():
            h_sc[d_idx] = jnp.zeros((h_sc.shape[1], h_sc.shape[2]), jnp.float32)
            c_sc[d_idx] = jnp.zeros((c_sc.shape[1], c_sc.shape[2]), jnp.float32)

        # fully static, unrolled inner loop over the time block
        for tt in range(T):
            col = (T - 1 - tt) if reverse else tt
            xg = xg_ref[:, col, :].astype(jnp.float32)        # (Bp, 4H)
            m_t = m_ref[0, :, col:col + 1]                    # (Bp, 1)
            h_prev = h_sc[d_idx]
            c_prev = c_sc[d_idx]
            # gates layout follows PyTorch nn.LSTM: [i, f, g, o]
            gates = xg + jnp.dot(h_prev.astype(whh.dtype), whh,
                                 preferred_element_type=jnp.float32)
            i_g = jax.nn.sigmoid(gates[:, 0 * H:1 * H])
            f_g = jax.nn.sigmoid(gates[:, 1 * H:2 * H])
            g_g = jnp.tanh(gates[:, 2 * H:3 * H])
            o_g = jax.nn.sigmoid(gates[:, 3 * H:4 * H])
            c_new = f_g * c_prev + i_g * g_g
            h_new = o_g * jnp.tanh(c_new)
            # packed-sequence behaviour: no state advance on padded steps
            c_sc[d_idx] = m_t * c_new + (1.0 - m_t) * c_prev
            h_upd = m_t * h_new + (1.0 - m_t) * h_prev
            h_sc[d_idx] = h_upd
            # fused logits_2 head on the pad_packed-style (zeroed) output;
            # VPU multiply + lane reduction instead of an N=1 MXU push.
            l2_ref[0, 0, :, col:col + 1] = jnp.sum(
                (h_upd * m_t) * w2, axis=1, keepdims=True)

    @pl.when(pl.program_id(0) == 0)
    def _():
        run_direction(0, reverse=False)

    @pl.when(pl.program_id(0) == 1)
    def _():
        run_direction(1, reverse=True)


def bilstm_logits2(gates, mask_r, whh_cat, w2_cat, T_blk):
    """gates: (Bp, Sp, 8H), mask_r: (NB, Bp, T_blk), whh_cat: (2, H, 4H),
    w2_cat: (2, 1, H).  Returns (2, NB, Bp, T_blk) logits_2 contributions."""
    Bp, Sp, _ = gates.shape
    H = whh_cat.shape[1]
    NB = Sp // T_blk

    def time_block(d, g):
        # forward direction (d=0): block g;  backward (d=1): block NB-1-g
        return g + d * (NB - 1 - 2 * g)

    return pl.pallas_call(
        _bilstm_kernel,
        out_shape=jax.ShapeDtypeStruct((2, NB, Bp, T_blk), jnp.float32),
        grid=(2, NB),
        in_specs=[
            pl.BlockSpec((Bp, T_blk, 4 * H),
                         lambda d, g: (0, time_block(d, g), d)),
            pl.BlockSpec((1, Bp, T_blk),
                         lambda d, g: (time_block(d, g), 0, 0)),
            pl.BlockSpec((1, H, 4 * H), lambda d, g: (d, 0, 0)),
            pl.BlockSpec((1, 1, H), lambda d, g: (d, 0, 0)),
        ],
        out_specs=pl.BlockSpec((1, 1, Bp, T_blk),
                               lambda d, g: (d, time_block(d, g), 0, 0)),
        scratch_shapes=[pltpu.VMEM((2, Bp, H), jnp.float32),   # h state
                        pltpu.VMEM((2, Bp, H), jnp.float32)],  # c state
        compiler_params=pltpu.CompilerParams(
            dimension_semantics=("parallel", "arbitrary")),
    )(gates, mask_r, whh_cat, w2_cat)


# ----------------------------------------------------------------------------
# Kernel 3: masked log-softmax over the sequence axis, row-tiled.
# ----------------------------------------------------------------------------
def _masked_log_softmax_kernel(logits_ref, mask_ref, out_ref):
    x = logits_ref[...]
    m = mask_ref[...]
    masked = m * x + (1.0 - m) * (-1e30)
    mx = jnp.max(masked, axis=-1, keepdims=True)
    z = masked - mx
    lse = jnp.log(jnp.sum(jnp.exp(z), axis=-1, keepdims=True))
    out_ref[...] = z - lse


def _softmax_row_tile(r):
    for t in (512, 256, 128, 64, 32, 16, 8):
        if r % t == 0:
            return t
    return r


def masked_log_softmax(logits, mask):
    R, S = logits.shape
    tb = _softmax_row_tile(R)
    return pl.pallas_call(
        _masked_log_softmax_kernel,
        out_shape=jax.ShapeDtypeStruct((R, S), jnp.float32),
        grid=(R // tb,),
        in_specs=[pl.BlockSpec((tb, S), lambda i: (i, 0)),
                  pl.BlockSpec((tb, S), lambda i: (i, 0))],
        out_specs=pl.BlockSpec((tb, S), lambda i: (i, 0)),
        compiler_params=pltpu.CompilerParams(
            dimension_semantics=("parallel",)),
    )(logits, mask)


# ----------------------------------------------------------------------------
# Parameter init (deterministic, synthetic) and forward-pass glue.
# ----------------------------------------------------------------------------
def init_params(key, hidden_size):
    H = hidden_size
    D = 2 * H
    ks = jax.random.split(key, 10)
    s = 0.1
    return dict(
        # mod_linear_1: nn.Linear(2H, 1)
        w1=jax.random.normal(ks[0], (D, 1), jnp.float32) * s,
        b1=jax.random.normal(ks[1], (1, 1), jnp.float32) * s,
        # LSTM forward dir: weight_ih stored transposed (2H, 4H),
        # weight_hh (H, 4H), b = b_ih + b_hh folded into one (1, 4H) vector
        w_ih_f=jax.random.normal(ks[2], (D, 4 * H), jnp.float32) * s,
        w_hh_f=jax.random.normal(ks[3], (H, 4 * H), jnp.float32) * s,
        b_f=jax.random.normal(ks[4], (1, 4 * H), jnp.float32) * s,
        # LSTM backward dir
        w_ih_b=jax.random.normal(ks[5], (D, 4 * H), jnp.float32) * s,
        w_hh_b=jax.random.normal(ks[6], (H, 4 * H), jnp.float32) * s,
        b_b=jax.random.normal(ks[7], (1, 4 * H), jnp.float32) * s,
        # mod_linear_2: nn.Linear(2H, 1)
        w2=jax.random.normal(ks[8], (D, 1), jnp.float32) * s,
        b2=jax.random.normal(ks[9], (1, 1), jnp.float32) * s,
    )


def bilstm_output_forward(params, mod, mask, compute_dtype=jnp.float32):
    """mod: (B, S, 2H) float32, mask: (B, S) {0,1}, right-padded.
    Returns (log_p1, log_p2), each (B, S).
    compute_dtype=jnp.bfloat16 enables bf16 matmul operands (f32 accumulation,
    f32 state / nonlinearities) on v6e/v7x at slight numeric drift."""
    B, S, D = mod.shape
    H = D // 2
    assert D == 2 * H and (4 * H) % 128 == 0, "hidden_size must be a multiple of 32"
    # NOTE: H % 128 == 0 additionally keeps the per-step gate slices lane-tile
    # aligned (perf only); packed-sequence emulation assumes right-padded masks.

    T_blk = 8 if S <= 8 else 16
    Sp = _round_up(S, T_blk)
    Bp = _round_up(B, 8)
    NB = Sp // T_blk

    mask_f = mask.astype(jnp.float32)
    if (Bp, Sp) != (B, S):
        mod_p = jnp.pad(mod, ((0, Bp - B), (0, Sp - S), (0, 0)))
        mask_p = jnp.pad(mask_f, ((0, Bp - B), (0, Sp - S)))
    else:
        mod_p, mask_p = mod, mask_f

    cdt = compute_dtype
    w_gates = jnp.concatenate([params["w_ih_f"], params["w_ih_b"]],
                              axis=1).astype(cdt)              # (2H, 8H)
    b_gates = jnp.concatenate([params["b_f"], params["b_b"]], axis=1)  # (1, 8H)
    w1_row = params["w1"].reshape(1, D)

    # one HBM pass over the activation (no transpose): gates + logits_1
    gates2d, l1_2d = fused_projection(
        mod_p.reshape(Bp * Sp, D), w_gates, b_gates, w1_row, params["b1"],
        gate_dtype=cdt)
    gates = gates2d.reshape(Bp, Sp, 8 * H)                     # free reshape
    logits_1p = l1_2d.reshape(Bp, Sp)                          # free reshape

    # BiLSTM recurrence with the logits_2 head fused in
    mask_r = mask_p.reshape(Bp, NB, T_blk).transpose(1, 0, 2)  # tiny
    whh_cat = jnp.stack([params["w_hh_f"], params["w_hh_b"]], axis=0).astype(cdt)
    w2_cat = params["w2"].reshape(2, 1, H)                     # [w2_fwd; w2_bwd]
    l2 = bilstm_logits2(gates, mask_r, whh_cat, w2_cat, T_blk)
    logits_2p = ((l2[0] + l2[1]).transpose(1, 0, 2).reshape(Bp, Sp)
                 + params["b2"][0, 0])
    # TODO(synk): F.dropout on the RNN output is identity in eval mode (drop_prob unused).

    # one row-tiled masked log-softmax call for both heads
    log_p = masked_log_softmax(
        jnp.concatenate([logits_1p, logits_2p], axis=0),
        jnp.concatenate([mask_p, mask_p], axis=0))
    return log_p[:B, :S], log_p[Bp:Bp + B, :S]


# ----------------------------------------------------------------------------
# Pure-JAX reference for correctness validation.
# ----------------------------------------------------------------------------
def _reference_forward(params, mod, mask):
    B, S, D = mod.shape
    H = D // 2
    mf = mask.astype(jnp.float32)
    logits_1 = jnp.einsum("bsd,do->bs", mod, params["w1"]) + params["b1"][0, 0]

    def direction(w_ih, w_hh, b, reverse):
        xg = jnp.einsum("bsd,dg->bsg", mod, w_ih) + b

        def step(carry, inp):
            h, c = carry
            x_t, m_t = inp
            gates = x_t + h @ w_hh
            i = jax.nn.sigmoid(gates[:, :H])
            f = jax.nn.sigmoid(gates[:, H:2 * H])
            g = jnp.tanh(gates[:, 2 * H:3 * H])
            o = jax.nn.sigmoid(gates[:, 3 * H:])
            c_new = f * c + i * g
            h_new = o * jnp.tanh(c_new)
            c = m_t * c_new + (1.0 - m_t) * c
            h = m_t * h_new + (1.0 - m_t) * h
            return (h, c), h * m_t

        xs = jnp.swapaxes(xg, 0, 1)
        ms = jnp.swapaxes(mf, 0, 1)[..., None]
        if reverse:
            xs, ms = xs[::-1], ms[::-1]
        init = (jnp.zeros((B, H), jnp.float32), jnp.zeros((B, H), jnp.float32))
        _, hs = jax.lax.scan(step, init, (xs, ms))
        if reverse:
            hs = hs[::-1]
        return jnp.swapaxes(hs, 0, 1)

    h_f = direction(params["w_ih_f"], params["w_hh_f"], params["b_f"], False)
    h_b = direction(params["w_ih_b"], params["w_hh_b"], params["b_b"], True)
    mod2 = jnp.concatenate([h_f, h_b], axis=-1)
    logits_2 = jnp.einsum("bsd,do->bs", mod2, params["w2"]) + params["b2"][0, 0]

    def mls(x):
        z = mf * x + (1.0 - mf) * (-1e30)
        return jax.nn.log_softmax(z, axis=-1)

    return mls(logits_1), mls(logits_2)


if __name__ == "__main__":
    key = jax.random.PRNGKey(0)
    B, S, H = 2, 8, 32
    k_mod, k_param = jax.random.split(key)

    mod = jax.random.normal(k_mod, (B, S, 2 * H), jnp.float32)
    lengths = jnp.array([8, 5], dtype=jnp.int32)          # right-padded sequences
    mask = (jnp.arange(S)[None, :] < lengths[:, None]).astype(jnp.float32)

    params = init_params(k_param, H)
    log_p1, log_p2 = bilstm_output_forward(params, mod, mask)
    jax.block_until_ready((log_p1, log_p2))

    assert log_p1.shape == (B, S) and log_p2.shape == (B, S)
    assert bool(jnp.all(jnp.isfinite(log_p1))) and bool(jnp.all(jnp.isfinite(log_p2)))

    ref1, ref2 = _reference_forward(params, mod, mask)
    assert bool(jnp.allclose(log_p1, ref1, rtol=1e-3, atol=1e-3)), "log_p1 mismatch"
    assert bool(jnp.allclose(log_p2, ref2, rtol=1e-3, atol=1e-3)), "log_p2 mismatch"
    print("KERNEL_OK")
</pallas_src>

<mosaic_0001>
module attributes {stable_mosaic.version = 11 : i64} {
  func.func @_proj_kernel(%arg0: i32, %arg1: memref<64x64xf32, #tpu.memory_space<vmem>>, %arg2: memref<64x256xf32, #tpu.memory_space<vmem>>, %arg3: memref<1x256xf32, #tpu.memory_space<vmem>>, %arg4: memref<1x64xf32, #tpu.memory_space<vmem>>, %arg5: memref<1x1xf32, #tpu.memory_space<vmem>>, %arg6: memref<64x256xf32, #tpu.memory_space<vmem>>, %arg7: memref<64x1xf32, #tpu.memory_space<vmem>>) attributes {dimension_semantics = [#tpu.dimension_semantics<parallel>], iteration_bounds = array<i64: 1>, scalar_prefetch = 0 : i64, scratch_operands = 0 : i64, tpu.core_type = #tpu.core_type<tc>, window_params = [{transform_indices = @transform_0, window_bounds = array<i64: 64, 64>}, {pipeline_mode = #tpu.pipeline_mode<synchronous>, transform_indices = @transform_1, window_bounds = array<i64: 64, 256>}, {pipeline_mode = #tpu.pipeline_mode<synchronous>, transform_indices = @transform_2, window_bounds = array<i64: 1, 256>}, {pipeline_mode = #tpu.pipeline_mode<synchronous>, transform_indices = @transform_3, window_bounds = array<i64: 1, 64>}, {pipeline_mode = #tpu.pipeline_mode<synchronous>, transform_indices = @transform_4, window_bounds = array<i64: 1, 1>}, {transform_indices = @transform_5, window_bounds = array<i64: 64, 256>}, {transform_indices = @transform_6, window_bounds = array<i64: 64, 1>}]} {
    %c0 = arith.constant 0 : index
    %c0_0 = arith.constant 0 : index
    %0 = vector.load %arg1[%c0, %c0_0] : memref<64x64xf32, #tpu.memory_space<vmem>>, vector<64x64xf32>
    %c0_1 = arith.constant 0 : index
    %c0_2 = arith.constant 0 : index
    %1 = vector.load %arg2[%c0_1, %c0_2] : memref<64x256xf32, #tpu.memory_space<vmem>>, vector<64x256xf32>
    %cst = arith.constant dense<0.000000e+00> : vector<64x256xf32>
    %2 = tpu.matmul %0, %1, %cst {dimension_numbers = #tpu.dot_dimension_numbers<[1], [0], [0], [1], [0, 0, 1, 1], [], []>} : vector<64x64xf32>, vector<64x256xf32>, vector<64x256xf32> -> vector<64x256xf32>
    %c0_3 = arith.constant 0 : index
    %c0_4 = arith.constant 0 : index
    %3 = vector.load %arg3[%c0_3, %c0_4] : memref<1x256xf32, #tpu.memory_space<vmem>>, vector<1x256xf32>
    %4 = vector.broadcast %3 : vector<1x256xf32> to vector<64x256xf32>
    %5 = arith.addf %2, %4 : vector<64x256xf32>
    %c0_5 = arith.constant 0 : index
    %c0_6 = arith.constant 0 : index
    %6 = vector.load %arg6[%c0_5, %c0_6] : memref<64x256xf32, #tpu.memory_space<vmem>>, vector<64x256xf32>
    tpu.vector_store %arg6[%c0_5, %c0_6], %5 {strides = array<i32>} : memref<64x256xf32, #tpu.memory_space<vmem>>, vector<64x256xf32>,
    %c0_7 = arith.constant 0 : index
    %c0_8 = arith.constant 0 : index
    %7 = vector.load %arg4[%c0_7, %c0_8] : memref<1x64xf32, #tpu.memory_space<vmem>>, vector<1x64xf32>
    %8 = vector.broadcast %7 : vector<1x64xf32> to vector<64x64xf32>
    %9 = arith.mulf %0, %8 : vector<64x64xf32>
    %cst_9 = arith.constant dense<0.000000e+00> : vector<64xf32>
    %10 = vector.multi_reduction <add>, %9, %cst_9 [1] : vector<64x64xf32> to vector<64xf32>
    %11 = vector.shape_cast %10 : vector<64xf32> to vector<64x1xf32>
    %c0_10 = arith.constant 0 : index
    %c0_11 = arith.constant 0 : index
    %12 = vector.load %arg5[%c0_10, %c0_11] : memref<1x1xf32, #tpu.memory_space<vmem>>, vector<1x1xf32>
    %13 = vector.broadcast %12 : vector<1x1xf32> to vector<64x1xf32>
    %14 = arith.addf %11, %13 : vector<64x1xf32>
    %c0_12 = arith.constant 0 : index
    %c0_13 = arith.constant 0 : index
    %15 = vector.load %arg7[%c0_12, %c0_13] : memref<64x1xf32, #tpu.memory_space<vmem>>, vector<64x1xf32>
    tpu.vector_store %arg7[%c0_12, %c0_13], %14 {strides = array<i32>} : memref<64x1xf32, #tpu.memory_space<vmem>>, vector<64x1xf32>,
    return
  }
  func.func @transform_0(%arg0: i32) -> (i32, i32) {
    %c0_i32 = arith.constant 0 : i32
    %c0_i32_0 = arith.constant 0 : i32
    return %arg0, %c0_i32 : i32, i32
  }
  func.func @transform_1(%arg0: i32) -> (i32, i32) {
    %c0_i32 = arith.constant 0 : i32
    %c0_i32_0 = arith.constant 0 : i32
    %c0_i32_1 = arith.constant 0 : i32
    return %c0_i32, %c0_i32_0 : i32, i32
  }
  func.func @transform_2(%arg0: i32) -> (i32, i32) {
    %c0_i32 = arith.constant 0 : i32
    %c0_i32_0 = arith.constant 0 : i32
    %c0_i32_1 = arith.constant 0 : i32
    return %c0_i32, %c0_i32_0 : i32, i32
  }
  func.func @transform_3(%arg0: i32) -> (i32, i32) {
    %c0_i32 = arith.constant 0 : i32
    %c0_i32_0 = arith.constant 0 : i32
    %c0_i32_1 = arith.constant 0 : i32
    return %c0_i32, %c0_i32_0 : i32, i32
  }
  func.func @transform_4(%arg0: i32) -> (i32, i32) {
    %c0_i32 = arith.constant 0 : i32
    %c0_i32_0 = arith.constant 0 : i32
    %c0_i32_1 = arith.constant 0 : i32
    return %c0_i32, %c0_i32_0 : i32, i32
  }
  func.func @transform_5(%arg0: i32) -> (i32, i32) {
    %c0_i32 = arith.constant 0 : i32
    %c0_i32_0 = arith.constant 0 : i32
    return %arg0, %c0_i32 : i32, i32
  }
  func.func @transform_6(%arg0: i32) -> (i32, i32) {
    %c0_i32 = arith.constant 0 : i32
    %c0_i32_0 = arith.constant 0 : i32
    return %arg0, %c0_i32 : i32, i32
  }
}

</mosaic_0001>

<bundles_post_ra>
// kernel: tpu_custom_call.1
= control target key start
LH: loop header
LB: loop body
LE: loop exit
PB: predicated region body
PF: predicated region fallthrough
CT: control target
= control target key end

     0   :  { %s592_s0 = inlined_call_operand.hbm [shape: f32[64,64], index: 0, kind: input, shape index: {}]   ;;  %s593_s1 = inlined_call_operand.hbm [shape: f32[64,256], index: 1, kind: input, shape index: {}]   ;;  %s594_s2 = inlined_call_operand.vmem [shape: f32[1,256], index: 2, kind: input, shape index: {}]   ;;  %s595_s3 = inlined_call_operand.vmem [shape: f32[1,64], index: 3, kind: input, shape index: {}]   ;;  %s596_s4 = inlined_call_operand.<no memory space> [shape: f32[1,1], index: 4, kind: input, shape index: {}]   ;;  %s597_s5 = inlined_call_operand.hbm [shape: f32[64,256], index: 5, kind: output, shape index: {0}]   ;;  %s598_s6 = inlined_call_operand.vmem [shape: f32[64,1], index: 6, kind: output, shape index: {1}]  }
   0x1   :  { %v12_v0 = vstv %s596_s4 }
   0x2   :  { %13 = vst [vmem:[#allocation2] sm:$0x1] %v12_v0 }
   0x3   :  { %14 = vsyncpa [#allocation4], 0 }
   0x4   :  { %15 = vsyncpa [#allocation7], 0 }
   0x5   :  { %16 = vsyncpa [#allocation5], 0  ;;  %s442_s23 = smov [#allocation3]   ;;  %s370_s27 = scalar_lea.hbm %s592_s0, 1024 }
   0x6   :  { %s22_s24 = sshll.u32 %s442_s23, 4  ;;  %p371_p0 = scmp.ne.s32.totalorder %s592_s0, %s370_s27  ;;  %s23_s24 = int_to_ptr.vmem [resolvable:$true] %s22_s24 }
   0x7   :  { %p374_p1 = scmp.lt.u32.totalorder %s370_s27, %s592_s0 }
   0x9   :  { %p376_p2 = pnand %p374_p1, %p371_p0 }
   0xb   :  { %379 = shalt.err (!%p376_p2)
}
   0xc   :  { %s380_s4 = scalar_lea.vmem %s23_s24, 1024  ;;  %p385_p4 = scmp.lt.s32.totalorder %s23_s24, %s23_s24 }
   0xd   :  { %p381_p3 = scmp.ne.s32.totalorder %s23_s24, %s380_s4  ;;  %p386_p5 = scmp.lt.s32.totalorder %s380_s4, %s380_s4 }
   0xf   :  { %p387_p6 = por %p386_p5, %p385_p4 }
  0x11   :  { %p388_p7 = pnand %p387_p6, %p381_p3 }
  0x13   :  { %391 = shalt.err (!%p388_p7)
}
  0x14   :  { %s443_s8 = smov 128   ;;  %s444_s9 = smov 8  }
  0x15   :  { %28 = dma.hbm_to_vmem [thread:$0]  %s592_s0, 1024, %s23_s24, [#allocation4], %s443_s8, %s443_s8, %s444_s9  }
  0x16   :  { %s445_s12 = smov [#allocation6]   ;;  %s392_s16 = scalar_lea.hbm %s593_s1, 2048 }
  0x17   :  { %s34_s13 = sshll.u32 %s445_s12, 4  ;;  %p393_p8 = scmp.ne.s32.totalorder %s593_s1, %s392_s16  ;;  %s35_s13 = int_to_ptr.vmem [resolvable:$true] %s34_s13 }
  0x18   :  { %p396_p9 = scmp.lt.u32.totalorder %s392_s16, %s593_s1 }
  0x1a   :  { %p398_p10 = pnand %p396_p9, %p393_p8 }
  0x1c   :  { %401 = shalt.err (!%p398_p10)
}
  0x1d   :  { %s402_s21 = scalar_lea.vmem %s35_s13, 2048  ;;  %p407_p12 = scmp.lt.s32.totalorder %s35_s13, %s35_s13 }
  0x1e   :  { %p403_p11 = scmp.ne.s32.totalorder %s35_s13, %s402_s21  ;;  %p408_p13 = scmp.lt.s32.totalorder %s402_s21, %s402_s21 }
  0x20   :  { %p409_p0 = por %p408_p13, %p407_p12 }
  0x22   :  { %p410_p1 = pnand %p409_p0, %p403_p11 }
  0x24   :  { %413 = shalt.err (!%p410_p1)
}
  0x25   :  { %s446_s0 = smov 256   ;;  %s447_s22 = smov 16  }
  0x26   :  { %40 = dma.hbm_to_vmem [thread:$0]  %s593_s1, 2048, %s35_s13, [#allocation7], %s446_s0, %s446_s0, %s447_s22  }
  0x27   :  { %436 = dma.done.wait [#allocation4], 1024  }
  0x28   :  { %437 = vsyncadd [#allocation4], 4294966272 }
  0x29   :  { %438 = dma.done.wait [#allocation7], 2048  }
  0x2a   :  { %439 = vsyncadd [#allocation7], 4294965248  ;;  %v448_v1 = vmov 0.0   ;;  %v62_v2 = vld [vmem:[#allocation6 + $0x8] sm:$0xff]  ;;  %v64_v3 = vld [vmem:[#allocation6 + $0x18] sm:$0xff]  ;;  %vm89_vm0 = vcmask 523264  }
  0x2b   :  { %178 = vmatprep.mubr.f32.mxu0 %v448_v1  ;;  %202 = vmatprep.mubr.f32.mxu1 %v448_v1  ;;  %v61_v4 = vld [vmem:[#allocation6] sm:$0xff]  ;;  %v338_v5 = vpack.c.bf16 %v64_v3, %v62_v2  ;;  %v63_v6 = vld [vmem:[#allocation6 + $0x10] sm:$0xff]  ;;  %v66_v7 = vld [vmem:[#allocation6 + $0x28] sm:$0xff]  ;;  %vm297_vm1 = vcmask 7168  }
  0x2c   :  { %v68_v8 = vld [vmem:[#allocation6 + $0x38] sm:$0xff]  ;;  %v340_v9 = vpack.c.bf16 %v63_v6, %v61_v4  ;;  %v65_v11 = vld [vmem:[#allocation6 + $0x20] sm:$0xff]  ;;  %v67_v12 = vld [vmem:[#allocation6 + $0x30] sm:$0xff]  ;;  %v79_v4 = vlaneseq }
  0x2d   :  { %v342_v10 = vpack.c.bf16 %v68_v8, %v66_v7  ;;  %v70_v13 = vld [vmem:[#allocation6 + $0x48] sm:$0xff]  ;;  %339 = vmatprep.subr.bf16.mxu0 %v338_v5  ;;  %354 = vmatprep.subr.bf16.mxu1 %v338_v5  ;;  %v72_v14 = vld [vmem:[#allocation6 + $0x58] sm:$0xff]  ;;  %v344_v15 = vpack.c.bf16 %v67_v12, %v65_v11  ;;  %v69_v17 = vld [vmem:[#allocation6 + $0x40] sm:$0xff] }
  0x2e   :  { %341 = vmatpush1.bf16.msra.mxu0 %v340_v9  ;;  %358 = vmatpush1.bf16.msra.mxu1 %v340_v9  ;;  %v346_v16 = vpack.c.bf16 %v72_v14, %v70_v13  ;;  %v71_v18 = vld [vmem:[#allocation6 + $0x50] sm:$0xff]  ;;  %v74_v19 = vld [vmem:[#allocation6 + $0x68] sm:$0xff]  ;;  %v76_v20 = vld [vmem:[#allocation6 + $0x78] sm:$0xff]  ;;  %v80_v5 = vshrl.u32 %v79_v4, 7 }
  0x2f   :  { %343 = vmatprep.subr.bf16.mxu0 %v342_v10  ;;  %355 = vmatprep.subr.bf16.mxu1 %v342_v10  ;;  %v348_v21 = vpack.c.bf16 %v71_v18, %v69_v17  ;;  %v53_v22 = vld [vmem:[#allocation3] sm:$0xff]  ;;  %v55_v23 = vld [vmem:[#allocation3 + $0x10] sm:$0xff]  ;;  %v336_v24 = vld [vmem:[%s595_s3] ss:$0 sm:$0xff]  ;;  %v350_v25 = vpack.c.bf16 %v76_v20, %v74_v19 }
  0x30   :  { %v73_v26 = vld [vmem:[#allocation6 + $0x60] sm:$0xff]  ;;  %v75_v27 = vld [vmem:[#allocation6 + $0x70] sm:$0xff]  ;;  %v252_v28 = vmul.f32 %v336_v24, %v55_v23  ;;  %v250_v29 = vmul.f32 %v336_v24, %v53_v22  ;;  %v54_v30 = vld [vmem:[#allocation3 + $0x8] sm:$0xff]  ;;  %v81_v6 = vsub.s32 0, %v80_v5  ;;  %v85_v8 = vsub.s32 1, %v80_v5 }
  0x31   :  { %v56_v31 = vld [vmem:[#allocation3 + $0x18] sm:$0xff]  ;;  %v251_v35 = vmul.f32 %v336_v24, %v54_v30  ;;  %v352_v36 = vpack.c.bf16 %v75_v27, %v73_v26  ;;  %v57_v37 = vld [vmem:[#allocation3 + $0x20] sm:$0xff]  ;;  %v58_v38 = vld [vmem:[#allocation3 + $0x28] sm:$0xff] }
  0x32   :  { %345 = vmatpush1.bf16.msra.mxu0 %v344_v15  ;;  %359 = vmatpush1.bf16.msra.mxu1 %v344_v15  ;;  %v264_v32 = vsel %vm89_vm0, %v252_v28, 0.0  ;;  %v258_v33 = vsel %vm89_vm0, %v250_v29, 0.0  ;;  %v253_v34 = vmul.f32 %v336_v24, %v56_v31  ;;  %v255_v41 = vmul.f32 %v336_v24, %v58_v38  ;;  %v59_v43 = vld [vmem:[#allocation3 + $0x30] sm:$0xff]  ;;  %v60_v44 = vld [vmem:[#allocation3 + $0x38] sm:$0xff] }
  0x33   :  { %347 = vmatprep.subr.bf16.mxu0 %v346_v16  ;;  %356 = vmatprep.subr.bf16.mxu1 %v346_v16  ;;  %v261_v40 = vsel %vm89_vm0, %v251_v35, 0.0  ;;  %v254_v42 = vmul.f32 %v336_v24, %v57_v37  ;;  %v257_v47 = vmul.f32 %v336_v24, %v60_v44  ;;  %v256_v48 = vmul.f32 %v336_v24, %v59_v43  ;;  %v337_v51 = vld [vmem:[#allocation2] ss:$0 sm:$0xff] }
  0x34   :  { %265 = vadd.xlane.f32.xlu1 %v264_v32  ;;  %259 = vadd.xlane.f32.xlu0 %v258_v33  ;;  %v267_v39 = vsel %vm89_vm0, %v253_v34, 0.0  ;;  %v273_v45 = vsel %vm89_vm0, %v255_v41, 0.0  ;;  %v77_v7 = vld [vmem:[%s594_s2] sm:$0x3]  ;;  %s449_s2 = smov [#allocation8]  }
  0x35   :  { %v270_v46 = vsel %vm89_vm0, %v254_v42, 0.0  ;;  %v279_v49 = vsel %vm89_vm0, %v257_v47, 0.0  ;;  %v276_v50 = vsel %vm89_vm0, %v256_v48, 0.0  ;;  %v82_v9 = vrot.slane %v77_v7, %v81_v6 }
  0x36   :  { %349 = vmatpush1.bf16.msra.mxu0 %v348_v21  ;;  %360 = vmatpush1.bf16.msra.mxu1 %v348_v21  ;;  %v86_v10 = vrot.slane %v77_v7, %v85_v8 }
  0x37   :  { %351 = vmatprep.subr.bf16.mxu0 %v350_v25  ;;  %357 = vmatprep.subr.bf16.mxu1 %v350_v25 }
  0x38   :  { %268 = vadd.xlane.f32.xlu1 %v267_v39  ;;  %262 = vadd.xlane.f32.xlu0 %v261_v40 }
  0x3a   :  { %353 = vmatpush1.bf16.msra.mxu0 %v352_v36  ;;  %361 = vmatpush1.bf16.msra.mxu1 %v352_v36 }
  0x3c   :  { %274 = vadd.xlane.f32.xlu1 %v273_v45  ;;  %271 = vadd.xlane.f32.xlu0 %v270_v46 }
  0x3d   :  { %328 = vmatmul.mubr.msk.f32.vlgmr.msra.gmra.mrb[0].mxu0 %vm89_vm0, %v53_v22  ;;  %332 = vmatmul.mubr.msk.f32.vlgmr.msra.gmra.mrb[0].mxu1 %vm89_vm0, %v57_v37 }
  0x3e   :  { %184 = vmatprep.mubr.f32.mxu0 %v448_v1  ;;  %208 = vmatprep.mubr.f32.mxu1 %v448_v1 }
  0x40   :  { %280 = vadd.xlane.f32.xlu1 %v279_v49  ;;  %277 = vadd.xlane.f32.xlu0 %v276_v50 }
  0x41   :  { %329 = vmatmul.mubr.msk.f32.gmra.mrb[2].mxu0 %vm89_vm0, %v54_v30  ;;  %333 = vmatmul.mubr.msk.f32.gmra.mrb[2].mxu1 %vm89_vm0, %v58_v38 }
  0x42   :  { %190 = vmatprep.mubr.f32.mxu0 %v448_v1  ;;  %214 = vmatprep.mubr.f32.mxu1 %v448_v1 }
  0x45   :  { %330 = vmatmul.mubr.msk.f32.gmra.mrb[4].mxu0 %vm89_vm0, %v55_v23  ;;  %334 = vmatmul.mubr.msk.f32.gmra.mrb[4].mxu1 %vm89_vm0, %v59_v43 }
  0x46   :  { %196 = vmatprep.mubr.f32.mxu0 %v448_v1  ;;  %220 = vmatprep.mubr.f32.mxu1 %v448_v1 }
  0x49   :  { %331 = vmatmul.mubr.msk.f32.gmra.mrb[6].mxu0 %vm89_vm0, %v56_v31  ;;  %335 = vmatmul.mubr.msk.f32.gmra.mrb[6].mxu1 %vm89_vm0, %v60_v44 }
  0xc1   :  { %v266_v52 = vpop.xlane.xlu1 %265  ;;  %v260_v53 = vpop.xlane.xlu0 %259 }
  0xc2   :  { %v291_v54 = vadd.f32 %v337_v51, %v266_v52  ;;  %v289_v55 = vadd.f32 %v337_v51, %v260_v53 }
  0xc4   :  { %300 = vst.msk [vmem:[%s598_s6 + $0x10] sm:$0xff] %vm297_vm1, %v291_v54  ;;  %298 = vst.msk [vmem:[%s598_s6] sm:$0xff] %vm297_vm1, %v289_v55 }
  0xc5   :  { %v269_v56 = vpop.xlane.xlu1 %268  ;;  %v263_v57 = vpop.xlane.xlu0 %262 }
  0xc6   :  { %v292_v58 = vadd.f32 %v337_v51, %v269_v56  ;;  %v290_v59 = vadd.f32 %v337_v51, %v263_v57 }
  0xc8   :  { %301 = vst.msk [vmem:[%s598_s6 + $0x18] sm:$0xff] %vm297_vm1, %v292_v58  ;;  %299 = vst.msk [vmem:[%s598_s6 + $0x8] sm:$0xff] %vm297_vm1, %v290_v59 }
  0xc9   :  { %v275_v60 = vpop.xlane.xlu1 %274  ;;  %v272_v61 = vpop.xlane.xlu0 %271 }
  0xca   :  { %v294_v62 = vadd.f32 %v337_v51, %v275_v60  ;;  %v293_v63 = vadd.f32 %v337_v51, %v272_v61 }
  0xcc   :  { %303 = vst.msk [vmem:[%s598_s6 + $0x28] sm:$0xff] %vm297_vm1, %v294_v62  ;;  %302 = vst.msk [vmem:[%s598_s6 + $0x20] sm:$0xff] %vm297_vm1, %v293_v63 }
  0xcd   :  { %v281_v0 = vpop.xlane.xlu1 %280  ;;  %v278_v1 = vpop.xlane.xlu0 %277 }
  0xce   :  { %v296_v2 = vadd.f32 %v337_v51, %v281_v0  ;;  %v295_v3 = vadd.f32 %v337_v51, %v278_v1 }
  0xd0   :  { %305 = vst.msk [vmem:[%s598_s6 + $0x38] sm:$0xff] %vm297_vm1, %v296_v2  ;;  %304 = vst.msk [vmem:[%s598_s6 + $0x30] sm:$0xff] %vm297_vm1, %v295_v3  ;;  %s311_s6 = sshll.u32 %s449_s2, 4  ;;  %s312_s6 = int_to_ptr.vmem [resolvable:$true] %s311_s6 }
  0xd1   :  { %s414_s18 = scalar_lea.vmem %s312_s6, 2048  ;;  %p419_p3 = scmp.lt.s32.totalorder %s312_s6, %s312_s6 }
  0xd2   :  { %p415_p2 = scmp.ne.s32.totalorder %s312_s6, %s414_s18  ;;  %p420_p4 = scmp.lt.s32.totalorder %s414_s18, %s414_s18 }
  0xd4   :  { %p421_p5 = por %p420_p4, %p419_p3 }
  0xd6   :  { %p422_p6 = pnand %p421_p5, %p415_p2 }
 0x110   :  { %v180_v11 = vpop.f32.mrb[0].mxu0  ;;  %v204_v12 = vpop.f32.mrb[0].mxu1 }
 0x111   :  { %v181_v13 = vadd.f32 %v180_v11, %v82_v9  ;;  %v205_v14 = vadd.f32 %v204_v12, %v82_v9  ;;  %v182_v15 = vpop.f32.mrb[1].mxu0  ;;  %v206_v16 = vpop.f32.mrb[1].mxu1 }
 0x112   :  { %v183_v17 = vadd.f32 %v182_v15, %v86_v10  ;;  %v207_v18 = vadd.f32 %v206_v16, %v86_v10 }
 0x113   :  { %227 = vst [vmem:[#allocation8] sm:$0xff] %v181_v13  ;;  %235 = vst [vmem:[#allocation8 + $0x40] sm:$0xff] %v205_v14 }
 0x114   :  { %228 = vst [vmem:[#allocation8 + $0x8] sm:$0xff] %v183_v17  ;;  %236 = vst [vmem:[#allocation8 + $0x48] sm:$0xff] %v207_v18  ;;  %v186_v19 = vpop.f32.mrb[2].mxu0  ;;  %v210_v20 = vpop.f32.mrb[2].mxu1 }
 0x115   :  { %v187_v21 = vadd.f32 %v186_v19, %v82_v9  ;;  %v211_v22 = vadd.f32 %v210_v20, %v82_v9  ;;  %v188_v23 = vpop.f32.mrb[3].mxu0  ;;  %v212_v24 = vpop.f32.mrb[3].mxu1 }
 0x116   :  { %v189_v25 = vadd.f32 %v188_v23, %v86_v10  ;;  %v213_v26 = vadd.f32 %v212_v24, %v86_v10 }
 0x117   :  { %229 = vst [vmem:[#allocation8 + $0x10] sm:$0xff] %v187_v21  ;;  %237 = vst [vmem:[#allocation8 + $0x50] sm:$0xff] %v211_v22 }
 0x118   :  { %230 = vst [vmem:[#allocation8 + $0x18] sm:$0xff] %v189_v25  ;;  %238 = vst [vmem:[#allocation8 + $0x58] sm:$0xff] %v213_v26  ;;  %v192_v27 = vpop.f32.mrb[4].mxu0  ;;  %v216_v28 = vpop.f32.mrb[4].mxu1 }
 0x119   :  { %v193_v29 = vadd.f32 %v192_v27, %v82_v9  ;;  %v217_v30 = vadd.f32 %v216_v28, %v82_v9  ;;  %v194_v31 = vpop.f32.mrb[5].mxu0  ;;  %v218_v32 = vpop.f32.mrb[5].mxu1 }
 0x11a   :  { %v195_v33 = vadd.f32 %v194_v31, %v86_v10  ;;  %v219_v34 = vadd.f32 %v218_v32, %v86_v10 }
 0x11b   :  { %231 = vst [vmem:[#allocation8 + $0x20] sm:$0xff] %v193_v29  ;;  %239 = vst [vmem:[#allocation8 + $0x60] sm:$0xff] %v217_v30 }
 0x11c   :  { %232 = vst [vmem:[#allocation8 + $0x28] sm:$0xff] %v195_v33  ;;  %240 = vst [vmem:[#allocation8 + $0x68] sm:$0xff] %v219_v34  ;;  %v198_v35 = vpop.f32.mrb[6].mxu0  ;;  %v222_v36 = vpop.f32.mrb[6].mxu1 }
 0x11d   :  { %v199_v37 = vadd.f32 %v198_v35, %v82_v9  ;;  %v223_v38 = vadd.f32 %v222_v36, %v82_v9  ;;  %v200_v39 = vpop.f32.mrb[7].mxu0  ;;  %v224_v40 = vpop.f32.mrb[7].mxu1 }
 0x11e   :  { %v201_v41 = vadd.f32 %v200_v39, %v86_v10  ;;  %v225_v42 = vadd.f32 %v224_v40, %v86_v10 }
 0x11f   :  { %233 = vst [vmem:[#allocation8 + $0x30] sm:$0xff] %v199_v37  ;;  %241 = vst [vmem:[#allocation8 + $0x70] sm:$0xff] %v223_v38 }
 0x120   :  { %234 = vst [vmem:[#allocation8 + $0x38] sm:$0xff] %v201_v41  ;;  %242 = vst [vmem:[#allocation8 + $0x78] sm:$0xff] %v225_v42 }
 0x121   :  { %425 = shalt.err (!%p422_p6)
}
 0x122   :  { %s426_s21 = scalar_lea.hbm %s597_s5, 2048 }
 0x123   :  { %p427_p7 = scmp.ne.s32.totalorder %s597_s5, %s426_s21  ;;  %p430_p8 = scmp.lt.u32.totalorder %s426_s21, %s597_s5 }
 0x125   :  { %p432_p9 = pnand %p430_p8, %p427_p7 }
 0x127   :  { %435 = shalt.err (!%p432_p9)
}
 0x128   :  { %317 = dma.vmem_to_hbm [thread:$0]  %s312_s6, 2048, %s597_s5, [#allocation5], %s446_s0, %s446_s0, %s447_s22  }
 0x129   :  { %440 = dma.done.wait [#allocation5], 2048  }
 0x12a   :  { %441 = vsyncadd [#allocation5], 4294965248 }
 0x12b   :  { %325 = vsyncpa [#allocation4], 1 }
 0x12c   :  { %326 = vsyncpa [#allocation7], 1 }
 0x12d   :  { %327 = vsyncpa [#allocation5], 1 }

</bundles_post_ra>
